<compile_context>
chip_gen: v5e
topology: v5e:2x2
jax: 0.10.0
libtpu: 0.0.40
codegen_flags: <defaults>
</compile_context>

<pallas_src>
import jax
import jax.numpy as jnp
from jax.experimental import pallas as pl
from jax.experimental.pallas import tpu as pltpu


def _round_up(a, b):
    return (a + b - 1) // b * b


def _residual_add_kernel(x_ref, r_ref, w_ref, b_ref, o_ref):
    # x_ref: (tm, H_pad)  full-width row tile (MXU LHS)
    # r_ref: (tm, tn)     residual tile matching this output column slab
    # w_ref: (H_pad, tn)  W column slab (resident across the inner row loop)
    # b_ref: (1, tn)      bias slab
    y = jnp.dot(x_ref[...], w_ref[...], preferred_element_type=jnp.float32)
    y = y + b_ref[...]                      # bias broadcast over rows (f32 accum)
    # tanh-approx GELU (EUP slot; free under the MXU roofline).
    # TODO(synk): use approximate=False if bit-parity with torch nn.GELU (erf) is required.
    y = jax.nn.gelu(y, approximate=True)
    o_ref[...] = (y + r_ref[...]).astype(o_ref.dtype)   # residual add


def residual_add(x, w, b, *, tm=512, tn=512):
    """out = gelu(x @ w + b) + x, fused in one Pallas kernel.

    x: (M, H), w: (H, H), b: (1, H).  Any M/H: inputs are zero-padded to tile
    boundaries and the result is sliced back.
    """
    M, H = x.shape
    assert w.shape == (H, H) and b.shape == (1, H)

    # Row tile: multiple of 8 sublanes, as large as padded M allows (<= tm).
    tm = min(tm, _round_up(M, 8))
    M_pad = _round_up(M, tm)
    # Column tile: multiple of 128 lanes (lane-dense stores); divides H_pad.
    tn = min(tn, _round_up(H, 128))
    H_pad = _round_up(H, tn)

    if (M_pad, H_pad) != (M, H):
        x = jnp.pad(x, ((0, M_pad - M), (0, H_pad - H)))
        w = jnp.pad(w, ((0, H_pad - H), (0, H_pad - H)))
        b = jnp.pad(b, ((0, 0), (0, H_pad - H)))

    grid = (H_pad // tn, M_pad // tm)   # j (W columns) outermost, i (rows) inner

    out = pl.pallas_call(
        _residual_add_kernel,
        out_shape=jax.ShapeDtypeStruct((M_pad, H_pad), x.dtype),
        grid_spec=pltpu.PrefetchScalarGridSpec(
            num_scalar_prefetch=0,
            grid=grid,
            in_specs=[
                pl.BlockSpec((tm, H_pad), lambda j, i: (i, 0)),  # x row tile (matmul LHS)
                pl.BlockSpec((tm, tn),    lambda j, i: (i, j)),  # residual tile
                pl.BlockSpec((H_pad, tn), lambda j, i: (0, j)),  # W slab, resident over i
                pl.BlockSpec((1, tn),     lambda j, i: (0, j)),  # bias slab
            ],
            out_specs=pl.BlockSpec((tm, tn), lambda j, i: (i, j)),
        ),
        compiler_params=pltpu.CompilerParams(
            dimension_semantics=("parallel", "parallel"),
            vmem_limit_bytes=64 * 1024 * 1024,
        ),
    )(x, x, w, b)   # x passed twice: matmul LHS + residual (different BlockSpecs)

    if (M_pad, H_pad) != (M, H):
        out = out[:M, :H]
    return out


def residual_add_ref(x, w, b):
    return jax.nn.gelu(x @ w + b, approximate=True) + x


if __name__ == "__main__":
    key = jax.random.PRNGKey(0)
    batch, seq, hidden = 2, 8, 32
    kx, kw, kb = jax.random.split(key, 3)

    # Deterministic inputs / parameters (synthetic; no checkpoint load).
    x = jax.random.normal(kx, (batch, seq, hidden), dtype=jnp.float32)
    w = jax.random.normal(kw, (hidden, hidden), dtype=jnp.float32) * 0.05
    b = jax.random.normal(kb, (1, hidden), dtype=jnp.float32) * 0.01

    x2d = x.reshape(batch * seq, hidden)            # glue reshape in plain JAX
    out = residual_add(x2d, w, b)
    out = jax.block_until_ready(out)

    ref = residual_add_ref(x2d, w, b)
    assert out.shape == (batch * seq, hidden)
    assert jnp.allclose(out, ref, atol=1e-5, rtol=1e-5), "mismatch vs reference"

    out3d = out.reshape(batch, seq, hidden)
    jax.block_until_ready(out3d)
    print("KERNEL_OK")
</pallas_src>

<mosaic_0001>
module attributes {stable_mosaic.version = 11 : i64} {
  func.func @_residual_add_kernel(%arg0: i32, %arg1: i32, %arg2: memref<16x128xf32, #tpu.memory_space<vmem>>, %arg3: memref<16x128xf32, #tpu.memory_space<vmem>>, %arg4: memref<128x128xf32, #tpu.memory_space<vmem>>, %arg5: memref<1x128xf32, #tpu.memory_space<vmem>>, %arg6: memref<16x128xf32, #tpu.memory_space<vmem>>) attributes {dimension_semantics = [#tpu.dimension_semantics<parallel>, #tpu.dimension_semantics<parallel>], iteration_bounds = array<i64: 1, 1>, scalar_prefetch = 0 : i64, scratch_operands = 0 : i64, tpu.core_type = #tpu.core_type<tc>, window_params = [{transform_indices = @transform_0, window_bounds = array<i64: 16, 128>}, {transform_indices = @transform_1, window_bounds = array<i64: 16, 128>}, {transform_indices = @transform_2, window_bounds = array<i64: 128, 128>}, {transform_indices = @transform_3, window_bounds = array<i64: 1, 128>}, {transform_indices = @transform_4, window_bounds = array<i64: 16, 128>}]} {
    %c0 = arith.constant 0 : index
    %c0_0 = arith.constant 0 : index
    %0 = vector.load %arg2[%c0, %c0_0] : memref<16x128xf32, #tpu.memory_space<vmem>>, vector<16x128xf32>
    %c0_1 = arith.constant 0 : index
    %c0_2 = arith.constant 0 : index
    %1 = vector.load %arg4[%c0_1, %c0_2] : memref<128x128xf32, #tpu.memory_space<vmem>>, vector<128x128xf32>
    %cst = arith.constant dense<0.000000e+00> : vector<16x128xf32>
    %2 = tpu.matmul %0, %1, %cst {dimension_numbers = #tpu.dot_dimension_numbers<[1], [0], [0], [1], [0, 0, 1, 1], [], []>} : vector<16x128xf32>, vector<128x128xf32>, vector<16x128xf32> -> vector<16x128xf32>
    %c0_3 = arith.constant 0 : index
    %c0_4 = arith.constant 0 : index
    %3 = vector.load %arg5[%c0_3, %c0_4] : memref<1x128xf32, #tpu.memory_space<vmem>>, vector<1x128xf32>
    %4 = vector.broadcast %3 : vector<1x128xf32> to vector<16x128xf32>
    %5 = arith.addf %2, %4 : vector<16x128xf32>
    %6 = arith.mulf %5, %5 : vector<16x128xf32>
    %7 = arith.mulf %5, %6 : vector<16x128xf32>
    %cst_5 = arith.constant 4.471500e-02 : f32
    %8 = vector.broadcast %cst_5 : f32 to vector<16x128xf32>
    %9 = arith.mulf %8, %7 : vector<16x128xf32>
    %10 = arith.addf %5, %9 : vector<16x128xf32>
    %cst_6 = arith.constant 0.797884583 : f32
    %11 = vector.broadcast %cst_6 : f32 to vector<16x128xf32>
    %12 = arith.mulf %11, %10 : vector<16x128xf32>
    %13 = math.tanh %12 : vector<16x128xf32>
    %cst_7 = arith.constant 1.000000e+00 : f32
    %14 = vector.broadcast %cst_7 : f32 to vector<16x128xf32>
    %15 = arith.addf %14, %13 : vector<16x128xf32>
    %cst_8 = arith.constant 5.000000e-01 : f32
    %16 = vector.broadcast %cst_8 : f32 to vector<16x128xf32>
    %17 = arith.mulf %16, %15 : vector<16x128xf32>
    %18 = arith.mulf %5, %17 : vector<16x128xf32>
    %c0_9 = arith.constant 0 : index
    %c0_10 = arith.constant 0 : index
    %19 = vector.load %arg3[%c0_9, %c0_10] : memref<16x128xf32, #tpu.memory_space<vmem>>, vector<16x128xf32>
    %20 = arith.addf %18, %19 : vector<16x128xf32>
    %c0_11 = arith.constant 0 : index
    %c0_12 = arith.constant 0 : index
    %21 = vector.load %arg6[%c0_11, %c0_12] : memref<16x128xf32, #tpu.memory_space<vmem>>, vector<16x128xf32>
    tpu.vector_store %arg6[%c0_11, %c0_12], %20 {strides = array<i32>} : memref<16x128xf32, #tpu.memory_space<vmem>>, vector<16x128xf32>,
    return
  }
  func.func @transform_0(%arg0: i32, %arg1: i32) -> (i32, i32) {
    %c0_i32 = arith.constant 0 : i32
    %c0_i32_0 = arith.constant 0 : i32
    return %arg1, %c0_i32 : i32, i32
  }
  func.func @transform_1(%arg0: i32, %arg1: i32) -> (i32, i32) {
    %c0_i32 = arith.constant 0 : i32
    return %arg1, %arg0 : i32, i32
  }
  func.func @transform_2(%arg0: i32, %arg1: i32) -> (i32, i32) {
    %c0_i32 = arith.constant 0 : i32
    %c0_i32_0 = arith.constant 0 : i32
    return %c0_i32, %arg0 : i32, i32
  }
  func.func @transform_3(%arg0: i32, %arg1: i32) -> (i32, i32) {
    %c0_i32 = arith.constant 0 : i32
    %c0_i32_0 = arith.constant 0 : i32
    return %c0_i32, %arg0 : i32, i32
  }
  func.func @transform_4(%arg0: i32, %arg1: i32) -> (i32, i32) {
    %c0_i32 = arith.constant 0 : i32
    return %arg1, %arg0 : i32, i32
  }
}

</mosaic_0001>

<bundles_post_ra>
// kernel: tpu_custom_call.1
= control target key start
LH: loop header
LB: loop body
LE: loop exit
PB: predicated region body
PF: predicated region fallthrough
CT: control target
= control target key end

     0   :  { %9 = vsyncpa [#allocation3], 0  ;;  %s341_s0 = inlined_call_operand.hbm [shape: f32[16,128], index: 0, kind: input, shape index: {}]   ;;  %s342_s1 = inlined_call_operand.hbm [shape: f32[16,128], index: 1, kind: input, shape index: {}]   ;;  %s343_s2 = inlined_call_operand.hbm [shape: f32[128,128], index: 2, kind: input, shape index: {}]   ;;  %s344_s3 = inlined_call_operand.vmem [shape: f32[1,128], index: 3, kind: input, shape index: {}]   ;;  %s345_s4 = inlined_call_operand.hbm [shape: f32[16,128], index: 4, kind: output, shape index: {}]  }
   0x1   :  { %10 = vsyncpa [#allocation6], 0 }
   0x2   :  { %11 = vsyncpa [#allocation4], 0  ;;  %s29_s17 = sshll.u32 %s342_s1, 4  ;;  %s283_s18 = smov [#allocation5]   ;;  %s30_s17 = int_to_ptr.hbm [resolvable:$true] %s29_s17 }
   0x3   :  { %s31_s19 = sshll.u32 %s283_s18, 4  ;;  %s16_s22 = sshll.u32 %s341_s0, 4  ;;  %s32_s19 = int_to_ptr.vmem [resolvable:$true] %s31_s19  ;;  %s17_s22 = int_to_ptr.hbm [resolvable:$true] %s16_s22 }
   0x4   :  { %s284_s23 = smov 128   ;;  %s285_s24 = smov 8  }
   0x5   :  { %37 = dma.hbm_to_vmem [thread:$0]  %s30_s17, 256, %s32_s19, [#allocation6], %s284_s23, %s284_s23, %s285_s24  }
   0x6   :  { %s286_s25 = smov [#allocation2]   ;;  %s42_s1 = sshll.u32 %s343_s2, 4  ;;  %s43_s1 = int_to_ptr.hbm [resolvable:$true] %s42_s1 }
   0x7   :  { %s18_s26 = sshll.u32 %s286_s25, 4  ;;  %s287_s0 = smov [#allocation7]   ;;  %s19_s26 = int_to_ptr.vmem [resolvable:$true] %s18_s26 }
   0x8   :  { %24 = dma.hbm_to_vmem [thread:$0]  %s17_s22, 256, %s19_s26, [#allocation3], %s284_s23, %s284_s23, %s285_s24  }
   0x9   :  { %s44_s29 = sshll.u32 %s287_s0, 4  ;;  %s45_s29 = int_to_ptr.vmem [resolvable:$true] %s44_s29 }
   0xa   :  { %50 = dma.hbm_to_vmem [thread:$0]  %s43_s1, 2048, %s45_s29, [#allocation6], %s284_s23, %s284_s23, %s285_s24  }
   0xb   :  { %277 = dma.done.wait [#allocation3], 256  }
   0xc   :  { %278 = vsyncadd [#allocation3], 4294967040 }
   0xd   :  { %279 = dma.done.wait [#allocation6], 2304  }
   0xe   :  { %280 = vsyncadd [#allocation6], 4294964992  ;;  %v82_v0 = vld [vmem:[#allocation7 + $0x78] sm:$0xff]  ;;  %v81_v1 = vld [vmem:[#allocation7 + $0x70] sm:$0xff]  ;;  %s140_s8 = sshll.u32 %s345_s4, 4  ;;  %s141_s8 = int_to_ptr.hbm [resolvable:$true] %s140_s8 }
   0xf   :  { %87 = vmatpush.msra.mxu0 %v82_v0  ;;  %154 = vmatpush.msra.mxu1 %v82_v0  ;;  %v80_v2 = vld [vmem:[#allocation7 + $0x68] sm:$0xff]  ;;  %v79_v3 = vld [vmem:[#allocation7 + $0x60] sm:$0xff]  ;;  %v78_v4 = vld [vmem:[#allocation7 + $0x58] sm:$0xff] }
  0x10   :  { %v77_v5 = vld [vmem:[#allocation7 + $0x50] sm:$0xff]  ;;  %v76_v6 = vld [vmem:[#allocation7 + $0x48] sm:$0xff]  ;;  %v75_v7 = vld [vmem:[#allocation7 + $0x40] sm:$0xff] }
  0x11   :  { %88 = vmatpush.msra.mxu0 %v81_v1  ;;  %155 = vmatpush.msra.mxu1 %v81_v1  ;;  %v74_v8 = vld [vmem:[#allocation7 + $0x38] sm:$0xff]  ;;  %v73_v9 = vld [vmem:[#allocation7 + $0x30] sm:$0xff]  ;;  %v72_v10 = vld [vmem:[#allocation7 + $0x28] sm:$0xff] }
  0x12   :  { %v71_v11 = vld [vmem:[#allocation7 + $0x20] sm:$0xff]  ;;  %v70_v12 = vld [vmem:[#allocation7 + $0x18] sm:$0xff]  ;;  %v69_v13 = vld [vmem:[#allocation7 + $0x10] sm:$0xff] }
  0x13   :  { %89 = vmatpush.msra.mxu0 %v80_v2  ;;  %156 = vmatpush.msra.mxu1 %v80_v2  ;;  %v68_v14 = vld [vmem:[#allocation7 + $0x8] sm:$0xff]  ;;  %v67_v15 = vld [vmem:[#allocation7] sm:$0xff]  ;;  %v128_v39 = vld [vmem:[#allocation5] sm:$0xff] }
  0x14   :  { %v65_v16 = vld [vmem:[#allocation2] sm:$0xff]  ;;  %v66_v17 = vld [vmem:[#allocation2 + $0x8] sm:$0xff]  ;;  %v129_v41 = vld [vmem:[#allocation5 + $0x8] sm:$0xff] }
  0x15   :  { %90 = vmatpush.msra.mxu0 %v79_v3  ;;  %157 = vmatpush.msra.mxu1 %v79_v3  ;;  %v176_v18 = vld [vmem:[%s344_s3] ss:$0 sm:$0xff]  ;;  %s288_s3 = smov [#allocation8]  }
  0x16   :  { %s138_s5 = sshll.u32 %s288_s3, 4  ;;  %s139_s5 = int_to_ptr.vmem [resolvable:$true] %s138_s5 }
  0x17   :  { %91 = vmatpush.msra.mxu0 %v78_v4  ;;  %158 = vmatpush.msra.mxu1 %v78_v4 }
  0x19   :  { %92 = vmatpush.msra.mxu0 %v77_v5  ;;  %159 = vmatpush.msra.mxu1 %v77_v5 }
  0x1b   :  { %93 = vmatpush.msra.mxu0 %v76_v6  ;;  %160 = vmatpush.msra.mxu1 %v76_v6 }
  0x1d   :  { %94 = vmatpush.msra.mxu0 %v75_v7  ;;  %161 = vmatpush.msra.mxu1 %v75_v7 }
  0x1f   :  { %95 = vmatpush.msra.mxu0 %v74_v8  ;;  %162 = vmatpush.msra.mxu1 %v74_v8 }
  0x21   :  { %96 = vmatpush.msra.mxu0 %v73_v9  ;;  %163 = vmatpush.msra.mxu1 %v73_v9 }
  0x23   :  { %97 = vmatpush.msra.mxu0 %v72_v10  ;;  %164 = vmatpush.msra.mxu1 %v72_v10 }
  0x25   :  { %98 = vmatpush.msra.mxu0 %v71_v11  ;;  %165 = vmatpush.msra.mxu1 %v71_v11 }
  0x27   :  { %99 = vmatpush.msra.mxu0 %v70_v12  ;;  %166 = vmatpush.msra.mxu1 %v70_v12 }
  0x29   :  { %100 = vmatpush.msra.mxu0 %v69_v13  ;;  %167 = vmatpush.msra.mxu1 %v69_v13 }
  0x2b   :  { %101 = vmatpush.msra.mxu0 %v68_v14  ;;  %168 = vmatpush.msra.mxu1 %v68_v14 }
  0x2d   :  { %102 = vmatpush.msra.mxu0 %v67_v15  ;;  %169 = vmatpush.msra.mxu1 %v67_v15 }
  0x2e   :  { %103 = vmatmul.f32.vlgmr.msra.gmra.mxu0 %v65_v16  ;;  %106 = vmatmul.f32.vlgmr.msra.gmra.mxu1 %v66_v17 }
  0xab   :  { %v104_v19 = vpop.f32.mrf.mxu0  ;;  %v107_v20 = vpop.f32.mrf.mxu1 }
  0xac   :  { %v105_v21 = vadd.f32 %v176_v18, %v104_v19  ;;  %v108_v22 = vadd.f32 %v176_v18, %v107_v20 }
  0xae   :  { %v110_v23 = vmul.f32 %v105_v21, %v105_v21  ;;  %v111_v24 = vmul.f32 %v108_v22, %v108_v22 }
  0xb0   :  { %v112_v25 = vmul.f32 %v110_v23, %v105_v21  ;;  %v113_v26 = vmul.f32 %v111_v24, %v108_v22 }
  0xb2   :  { %v114_v27 = vmul.f32 0.044715, %v112_v25  ;;  %v115_v28 = vmul.f32 0.044715, %v113_v26 }
  0xb4   :  { %v116_v29 = vadd.f32 %v114_v27, %v105_v21  ;;  %v117_v30 = vadd.f32 %v115_v28, %v108_v22 }
  0xb6   :  { %v118_v31 = vmul.f32 0.7978846, %v116_v29  ;;  %v119_v32 = vmul.f32 0.7978846, %v117_v30 }
  0xb8   :  { %177 = vtanh.f32 %v118_v31 }
  0xb9   :  { %179 = vtanh.f32 %v119_v32 }
  0xbe   :  { %v178_v33 = vpop.eup %177 }
  0xbf   :  { %v180_v34 = vpop.eup %179  ;;  %v122_v35 = vadd.f32 1.0, %v178_v33 }
  0xc0   :  { %v123_v36 = vadd.f32 1.0, %v180_v34 }
  0xc1   :  { %v124_v37 = vmul.f32 0.5, %v122_v35 }
  0xc2   :  { %v125_v38 = vmul.f32 0.5, %v123_v36 }
  0xc3   :  { %v126_v40 = vmul.f32 %v124_v37, %v105_v21 }
  0xc4   :  { %v127_v42 = vmul.f32 %v125_v38, %v108_v22 }
  0xc5   :  { %v130_v43 = vadd.f32 %v128_v39, %v126_v40 }
  0xc6   :  { %v131_v44 = vadd.f32 %v129_v41, %v127_v42 }
  0xc7   :  { %132 = vst [vmem:[#allocation8] sm:$0xff] %v130_v43 }
  0xc8   :  { %133 = vst [vmem:[#allocation8 + $0x8] sm:$0xff] %v131_v44 }
  0xc9   :  { %146 = dma.vmem_to_hbm [thread:$0]  %s139_s5, 256, %s141_s8, [#allocation4], %s284_s23, %s284_s23, %s285_s24  }
  0xca   :  { %281 = dma.done.wait [#allocation4], 256  }
  0xcb   :  { %282 = vsyncadd [#allocation4], 4294967040 }
  0xcc   :  { %151 = vsyncpa [#allocation3], 1 }
  0xcd   :  { %152 = vsyncpa [#allocation6], 1 }
  0xce   :  { %153 = vsyncpa [#allocation4], 1 }

</bundles_post_ra>
